<compile_context>
chip_gen: v7x
topology: tpu7x:2x2x1
jax: 0.10.0
libtpu: 0.0.40
codegen_flags: <defaults>
</compile_context>

<pallas_src>
import functools

import jax
import jax.numpy as jnp
from jax.experimental import pallas as pl
from jax.experimental.pallas import tpu as pltpu


def _round_up(x, m):
    return ((x + m - 1) // m) * m


def _vmem_budget_bytes():
    """Scoped-VMEM budget used for tile sizing (v5e/v6e: 128 MiB physical,
    v7x: 64 MiB per TensorCore).  Conservative fallback if the query fails."""
    try:
        cap = int(pltpu.get_tpu_info().vmem_capacity_bytes)
    except Exception:
        cap = 64 << 20
    return min(96 << 20, (cap * 3) // 4)


def _fold_bn_into_linear(params):
    """Fold BatchNorm1d (running stats + affine) into the Linear weight/bias:
         ((x - mu) * gamma / sqrt(var+eps) + beta) @ W^T + b
       ==  x @ (scale * W^T) + (shift @ W^T + b)          (all math in f32)."""
    eps = params["eps"]
    inv_std = jax.lax.rsqrt(params["running_var"].astype(jnp.float32) + eps)
    scale = params["gamma"].astype(jnp.float32) * inv_std                  # (ni,)
    shift = (params["beta"].astype(jnp.float32)
             - params["running_mean"].astype(jnp.float32) * scale)         # (ni,)
    w_t = params["w"].astype(jnp.float32).T                                # (ni, nf)
    w_eff = w_t * scale[:, None]                                           # (ni, nf)
    b_eff = params["b"].astype(jnp.float32) + shift @ w_t                  # (nf,)
    return w_eff, b_eff


# --------------------------------- kernels ----------------------------------
def _fused_permute_kernel(x_ref, w_ref, bias_ref, o_ref, *, batch, ts,
                          compute_dtype):
    """Matmul + bias with the (s, b) -> (b, s) output permute fused in.

    x_ref:    (ts*batch, ni)   activation rows, s-major / b-minor (input dtype)
    w_ref:    (ni, tn)         BN-folded weight (compute dtype)
    bias_ref: (1, tn)          BN-folded bias (f32)
    o_ref:    (batch, ts, tn)  block of the (B, S, nf_pad) output
    """
    w = w_ref[...]
    bias = bias_ref[...]
    for b in range(batch):                       # static unroll, batch is small
        # Rows b, b+batch, b+2*batch, ... of the tile are exactly batch b's
        # sequence rows -> sublane-strided read, cast fused right before the MXU.
        xb = x_ref[pl.ds(b, ts, stride=batch), :].astype(compute_dtype)
        acc = jnp.dot(xb, w, preferred_element_type=jnp.float32)
        o_ref[b, :, :] = (acc + bias).astype(o_ref.dtype)


def _rowwise_kernel(x_ref, w_ref, bias_ref, o_ref, *, compute_dtype):
    """Fallback: plain row-tiled matmul + bias; output permuted in the wrapper."""
    acc = jnp.dot(x_ref[...].astype(compute_dtype), w_ref[...],
                  preferred_element_type=jnp.float32)
    o_ref[...] = (acc + bias_ref[...]).astype(o_ref.dtype)


# --------------------------------- wrapper ----------------------------------
def _pick_ts(S, B, ni, tn, in_bytes, w_bytes, out_bytes, budget):
    """Sequence-tile size: big (≈2k output rows / step), trimmed to VMEM."""
    target_rows = 2048
    ts = min(S, max(1, target_rows // max(B, 1)))
    if ts < S:
        ts = max(8, (ts // 8) * 8)               # multiple of 8 (layout rule)
    elif S >= 256:
        ts = _round_up((S + 1) // 2, 8)          # >=2 grid steps for v7x megacore

    def step_bytes(t):
        rows = t * B
        return (2 * rows * ni * in_bytes         # double-buffered x tile (f32 in)
                + 2 * ni * tn * w_bytes          # weight stream (<= 2 buffers)
                + 2 * B * t * tn * out_bytes     # double-buffered output tile
                + 2 * rows * tn * 4)             # f32 accumulator / epilogue temps

    while ts > 8 and step_bytes(ts) > budget:
        nxt = max(8, ((ts // 2) // 8) * 8)
        if nxt == ts:
            break
        ts = nxt
    return ts


def linear_block_sentence(x, params, *, compute_dtype=jnp.bfloat16,
                          out_dtype=None, fuse_output_permute=True):
    """x: (S, B, ni) -> (B, S, nf), matching the PyTorch module in eval mode."""
    S, B, ni = x.shape
    nf = params["w"].shape[0]
    out_dtype = x.dtype if out_dtype is None else out_dtype

    w_eff, b_eff = _fold_bn_into_linear(params)

    budget = _vmem_budget_bytes()
    in_bytes = jnp.dtype(x.dtype).itemsize
    w_bytes = jnp.dtype(compute_dtype).itemsize
    out_bytes = jnp.dtype(out_dtype).itemsize

    # ---- Lane-dense output + weight residency / N-tiling decision ----------
    nf_pad = _round_up(nf, 128)
    if ni * nf_pad * w_bytes <= budget // 4:
        tn = nf_pad                               # whole weight VMEM-resident
    else:
        nf_pad = _round_up(nf, 256)               # full v6e/v7x MXU width tiles
        tn = 256
    # NOTE: ni (K) is intentionally NOT padded: that would cost a full extra
    # read+write pass over x, which outweighs the masked-K-load penalty here.

    if nf_pad != nf:
        w_eff = jnp.pad(w_eff, ((0, 0), (0, nf_pad - nf)))
        b_eff = jnp.pad(b_eff, (0, nf_pad - nf))
    w_eff = w_eff.astype(compute_dtype)
    b_eff = b_eff.reshape(1, nf_pad).astype(jnp.float32)

    # x is consumed as (S*B, ni): a free, contiguous reshape — no transpose,
    # no cast (cast happens inside the kernel), no M padding (masked boundary).
    x2d = x.reshape(S * B, ni)

    ts = _pick_ts(S, B, ni, tn, in_bytes, w_bytes, out_bytes, budget)
    grid_s = pl.cdiv(S, ts)
    grid_n = nf_pad // tn

    cparams = pltpu.CompilerParams(
        dimension_semantics=("parallel", "parallel"),
        vmem_limit_bytes=int(budget))

    # ---- Fused path: kernel writes (B, S, nf_pad) directly ------------------
    if fuse_output_permute:
        kern = functools.partial(_fused_permute_kernel, batch=B, ts=ts,
                                 compute_dtype=compute_dtype)
        out = None
        try:
            out = pl.pallas_call(
                kern,
                out_shape=jax.ShapeDtypeStruct((B, S, nf_pad), out_dtype),
                grid_spec=pltpu.PrefetchScalarGridSpec(
                    num_scalar_prefetch=0,
                    grid=(grid_s, grid_n),
                    in_specs=[
                        pl.BlockSpec((ts * B, ni), lambda i, j: (i, 0)),
                        pl.BlockSpec((ni, tn), lambda i, j: (0, j)),
                        pl.BlockSpec((1, tn), lambda i, j: (0, j)),
                    ],
                    out_specs=pl.BlockSpec((B, ts, tn), lambda i, j: (0, i, j)),
                ),
                compiler_params=cparams,
            )(x2d, w_eff, b_eff)
            out = jax.block_until_ready(out)
        except Exception:
            out = None  # lowering rejected on this Mosaic version -> fallback
        if out is not None:
            return out if nf_pad == nf else out[:, :, :nf]

    # ---- Fallback: 2-D matmul, permute the (smaller) output in the wrapper --
    M = S * B
    grid_m = pl.cdiv(M, ts * B)
    kern = functools.partial(_rowwise_kernel, compute_dtype=compute_dtype)
    out2d = pl.pallas_call(
        kern,
        out_shape=jax.ShapeDtypeStruct((M, nf_pad), out_dtype),
        grid_spec=pltpu.PrefetchScalarGridSpec(
            num_scalar_prefetch=0,
            grid=(grid_m, grid_n),
            in_specs=[
                pl.BlockSpec((ts * B, ni), lambda i, j: (i, 0)),
                pl.BlockSpec((ni, tn), lambda i, j: (0, j)),
                pl.BlockSpec((1, tn), lambda i, j: (0, j)),
            ],
            out_specs=pl.BlockSpec((ts * B, tn), lambda i, j: (i, j)),
        ),
        compiler_params=cparams,
    )(x2d, w_eff, b_eff)
    out2d = out2d[:, :nf]
    return jnp.transpose(out2d.reshape(S, B, nf), (1, 0, 2))


# ------------------------------ reference -----------------------------------
def reference(x, params):
    """Pure-JAX reference mirroring the PyTorch eval forward."""
    eps = params["eps"]
    xn = (x - params["running_mean"]) / jnp.sqrt(params["running_var"] + eps)
    xn = xn * params["gamma"] + params["beta"]
    # dropout is identity in eval
    return jnp.einsum("sbc,fc->bsf", xn, params["w"]) + params["b"]


def make_params(key, ni, nf):
    k1, k2, k3, k4, k5, k6 = jax.random.split(key, 6)
    bound = 1.0 / jnp.sqrt(ni)
    return {
        # nn.Linear(ni, nf) default init: U(-1/sqrt(ni), 1/sqrt(ni))
        "w": jax.random.uniform(k1, (nf, ni), jnp.float32, -bound, bound),
        "b": jax.random.uniform(k2, (nf,), jnp.float32, -bound, bound),
        # nn.BatchNorm1d(ni) params / running stats (randomized so the BN path
        # is actually exercised; PyTorch defaults would make it an identity).
        "gamma": 1.0 + 0.1 * jax.random.normal(k3, (ni,), jnp.float32),
        "beta": 0.1 * jax.random.normal(k4, (ni,), jnp.float32),
        "running_mean": 0.1 * jax.random.normal(k5, (ni,), jnp.float32),
        "running_var": 1.0 + 0.1 * jax.random.uniform(k6, (ni,), jnp.float32),
        "eps": 1e-5,
    }


if __name__ == "__main__":
    S, B, ni, nf = 8, 2, 32, 16   # x: (seq, batch, ni) as implied by the permutes

    key = jax.random.PRNGKey(0)
    kx, kp = jax.random.split(key)
    x = jax.random.normal(kx, (S, B, ni), jnp.float32)
    params = make_params(kp, ni, nf)

    ref = reference(x, params)

    # 1) f32 MXU path, f32 output: tight check of the fused BN+Linear algebra.
    out_f32 = jax.block_until_ready(
        linear_block_sentence(x, params, compute_dtype=jnp.float32))
    assert out_f32.shape == (B, S, nf), out_f32.shape
    assert out_f32.dtype == jnp.float32
    assert jnp.allclose(out_f32, ref, atol=1e-4, rtol=1e-4), float(
        jnp.max(jnp.abs(out_f32 - ref)))

    # 2) Fast path: bf16 MXU operands + bf16 output (halves HBM writeback).
    out_bf16 = jax.block_until_ready(
        linear_block_sentence(x, params, out_dtype=jnp.bfloat16))
    assert out_bf16.shape == (B, S, nf), out_bf16.shape
    assert out_bf16.dtype == jnp.bfloat16
    diff = jnp.max(jnp.abs(out_bf16.astype(jnp.float32) - ref))
    assert jnp.allclose(out_bf16.astype(jnp.float32), ref,
                        atol=5e-2, rtol=5e-2), float(diff)

    # 3) Default dtypes (bf16 compute, f32 out) — drop-in replacement path.
    out_def = jax.block_until_ready(linear_block_sentence(x, params))
    assert out_def.shape == (B, S, nf) and out_def.dtype == jnp.float32
    assert jnp.allclose(out_def, ref, atol=5e-2, rtol=5e-2), float(
        jnp.max(jnp.abs(out_def - ref)))

    print("KERNEL_OK")
</pallas_src>

<mosaic_0001>
module attributes {stable_mosaic.version = 11 : i64} {
  func.func @_fused_permute_kernel(%arg0: i32, %arg1: i32, %arg2: memref<16x32xf32, #tpu.memory_space<vmem>>, %arg3: memref<32x128xf32, #tpu.memory_space<vmem>>, %arg4: memref<1x128xf32, #tpu.memory_space<vmem>>, %arg5: memref<2x8x128xf32, #tpu.memory_space<vmem>>) attributes {dimension_semantics = [#tpu.dimension_semantics<parallel>, #tpu.dimension_semantics<parallel>], iteration_bounds = array<i64: 1, 1>, scalar_prefetch = 0 : i64, scratch_operands = 0 : i64, tpu.core_type = #tpu.core_type<tc>, window_params = [{transform_indices = @transform_0, window_bounds = array<i64: 16, 32>}, {transform_indices = @transform_1, window_bounds = array<i64: 32, 128>}, {transform_indices = @transform_2, window_bounds = array<i64: 1, 128>}, {transform_indices = @transform_3, window_bounds = array<i64: 2, 8, 128>}]} {
    %c0 = arith.constant 0 : index
    %c0_0 = arith.constant 0 : index
    %0 = vector.load %arg3[%c0, %c0_0] : memref<32x128xf32, #tpu.memory_space<vmem>>, vector<32x128xf32>
    %c0_1 = arith.constant 0 : index
    %c0_2 = arith.constant 0 : index
    %1 = vector.load %arg4[%c0_1, %c0_2] : memref<1x128xf32, #tpu.memory_space<vmem>>, vector<1x128xf32>
    %c0_3 = arith.constant 0 : index
    %c0_4 = arith.constant 0 : index
    %2 = tpu.strided_load %arg2[%c0_3, %c0_4] {strides = array<i32: 2, 1>} : memref<16x32xf32, #tpu.memory_space<vmem>>, vector<8x32xf32>
    %cst = arith.constant dense<0.000000e+00> : vector<8x128xf32>
    %3 = tpu.matmul %2, %0, %cst {dimension_numbers = #tpu.dot_dimension_numbers<[1], [0], [0], [1], [0, 0, 1, 1], [], []>} : vector<8x32xf32>, vector<32x128xf32>, vector<8x128xf32> -> vector<8x128xf32>
    %4 = vector.broadcast %1 : vector<1x128xf32> to vector<8x128xf32>
    %5 = arith.addf %3, %4 : vector<8x128xf32>
    %c0_5 = arith.constant 0 : index
    %c0_6 = arith.constant 0 : index
    %c0_7 = arith.constant 0 : index
    %6 = vector.load %arg5[%c0_5, %c0_6, %c0_7] : memref<2x8x128xf32, #tpu.memory_space<vmem>>, vector<1x8x128xf32>
    %7 = vector.shape_cast %6 : vector<1x8x128xf32> to vector<8x128xf32>
    %8 = vector.shape_cast %5 : vector<8x128xf32> to vector<1x8x128xf32>
    tpu.vector_store %arg5[%c0_5, %c0_6, %c0_7], %8 {strides = array<i32>} : memref<2x8x128xf32, #tpu.memory_space<vmem>>, vector<1x8x128xf32>,
    %c1 = arith.constant 1 : index
    %c0_8 = arith.constant 0 : index
    %9 = tpu.strided_load %arg2[%c1, %c0_8] {strides = array<i32: 2, 1>} : memref<16x32xf32, #tpu.memory_space<vmem>>, vector<8x32xf32>
    %cst_9 = arith.constant dense<0.000000e+00> : vector<8x128xf32>
    %10 = tpu.matmul %9, %0, %cst_9 {dimension_numbers = #tpu.dot_dimension_numbers<[1], [0], [0], [1], [0, 0, 1, 1], [], []>} : vector<8x32xf32>, vector<32x128xf32>, vector<8x128xf32> -> vector<8x128xf32>
    %11 = vector.broadcast %1 : vector<1x128xf32> to vector<8x128xf32>
    %12 = arith.addf %10, %11 : vector<8x128xf32>
    %c1_10 = arith.constant 1 : index
    %c0_11 = arith.constant 0 : index
    %c0_12 = arith.constant 0 : index
    %13 = vector.load %arg5[%c1_10, %c0_11, %c0_12] : memref<2x8x128xf32, #tpu.memory_space<vmem>>, vector<1x8x128xf32>
    %14 = vector.shape_cast %13 : vector<1x8x128xf32> to vector<8x128xf32>
    %15 = vector.shape_cast %12 : vector<8x128xf32> to vector<1x8x128xf32>
    tpu.vector_store %arg5[%c1_10, %c0_11, %c0_12], %15 {strides = array<i32>} : memref<2x8x128xf32, #tpu.memory_space<vmem>>, vector<1x8x128xf32>,
    return
  }
  func.func @transform_0(%arg0: i32, %arg1: i32) -> (i32, i32) {
    %c0_i32 = arith.constant 0 : i32
    %c0_i32_0 = arith.constant 0 : i32
    return %arg0, %c0_i32 : i32, i32
  }
  func.func @transform_1(%arg0: i32, %arg1: i32) -> (i32, i32) {
    %c0_i32 = arith.constant 0 : i32
    %c0_i32_0 = arith.constant 0 : i32
    return %c0_i32, %arg1 : i32, i32
  }
  func.func @transform_2(%arg0: i32, %arg1: i32) -> (i32, i32) {
    %c0_i32 = arith.constant 0 : i32
    %c0_i32_0 = arith.constant 0 : i32
    return %c0_i32, %arg1 : i32, i32
  }
  func.func @transform_3(%arg0: i32, %arg1: i32) -> (i32, i32, i32) {
    %c0_i32 = arith.constant 0 : i32
    %c0_i32_0 = arith.constant 0 : i32
    return %c0_i32, %arg0, %arg1 : i32, i32, i32
  }
}

module attributes {stable_mosaic.version = 11 : i64} {
  func.func @_rowwise_kernel(%arg0: i32, %arg1: i32, %arg2: memref<16x32xf32, #tpu.memory_space<vmem>>, %arg3: memref<32x128xf32, #tpu.memory_space<vmem>>, %arg4: memref<1x128xf32, #tpu.memory_space<vmem>>, %arg5: memref<16x128xf32, #tpu.memory_space<vmem>>) attributes {dimension_semantics = [#tpu.dimension_semantics<parallel>, #tpu.dimension_semantics<parallel>], iteration_bounds = array<i64: 1, 1>, scalar_prefetch = 0 : i64, scratch_operands = 0 : i64, tpu.core_type = #tpu.core_type<tc>, window_params = [{transform_indices = @transform_0, window_bounds = array<i64: 16, 32>}, {transform_indices = @transform_1, window_bounds = array<i64: 32, 128>}, {transform_indices = @transform_2, window_bounds = array<i64: 1, 128>}, {transform_indices = @transform_3, window_bounds = array<i64: 16, 128>}]} {
    %c0 = arith.constant 0 : index
    %c0_0 = arith.constant 0 : index
    %0 = vector.load %arg2[%c0, %c0_0] : memref<16x32xf32, #tpu.memory_space<vmem>>, vector<16x32xf32>
    %c0_1 = arith.constant 0 : index
    %c0_2 = arith.constant 0 : index
    %1 = vector.load %arg3[%c0_1, %c0_2] : memref<32x128xf32, #tpu.memory_space<vmem>>, vector<32x128xf32>
    %cst = arith.constant dense<0.000000e+00> : vector<16x128xf32>
    %2 = tpu.matmul %0, %1, %cst {dimension_numbers = #tpu.dot_dimension_numbers<[1], [0], [0], [1], [0, 0, 1, 1], [], []>} : vector<16x32xf32>, vector<32x128xf32>, vector<16x128xf32> -> vector<16x128xf32>
    %c0_3 = arith.constant 0 : index
    %c0_4 = arith.constant 0 : index
    %3 = vector.load %arg4[%c0_3, %c0_4] : memref<1x128xf32, #tpu.memory_space<vmem>>, vector<1x128xf32>
    %4 = vector.broadcast %3 : vector<1x128xf32> to vector<16x128xf32>
    %5 = arith.addf %2, %4 : vector<16x128xf32>
    %c0_5 = arith.constant 0 : index
    %c0_6 = arith.constant 0 : index
    %6 = vector.load %arg5[%c0_5, %c0_6] : memref<16x128xf32, #tpu.memory_space<vmem>>, vector<16x128xf32>
    tpu.vector_store %arg5[%c0_5, %c0_6], %5 {strides = array<i32>} : memref<16x128xf32, #tpu.memory_space<vmem>>, vector<16x128xf32>,
    return
  }
  func.func @transform_0(%arg0: i32, %arg1: i32) -> (i32, i32) {
    %c0_i32 = arith.constant 0 : i32
    %c0_i32_0 = arith.constant 0 : i32
    return %arg0, %c0_i32 : i32, i32
  }
  func.func @transform_1(%arg0: i32, %arg1: i32) -> (i32, i32) {
    %c0_i32 = arith.constant 0 : i32
    %c0_i32_0 = arith.constant 0 : i32
    return %c0_i32, %arg1 : i32, i32
  }
  func.func @transform_2(%arg0: i32, %arg1: i32) -> (i32, i32) {
    %c0_i32 = arith.constant 0 : i32
    %c0_i32_0 = arith.constant 0 : i32
    return %c0_i32, %arg1 : i32, i32
  }
  func.func @transform_3(%arg0: i32, %arg1: i32) -> (i32, i32) {
    %c0_i32 = arith.constant 0 : i32
    return %arg0, %arg1 : i32, i32
  }
}

</mosaic_0001>

<bundles_post_ra>
// kernel: tpu_custom_call.1
= control target key start
LH: loop header
LB: loop body
LE: loop exit
PB: predicated region body
PF: predicated region fallthrough
CT: control target
= control target key end

     0   :  { %8 = vsyncpa [#allocation3], 0  ;;  %s428_s0 = inlined_call_operand.hbm [shape: f32[16,32], index: 0, kind: input, shape index: {}]   ;;  %s429_s1 = inlined_call_operand.hbm [shape: f32[32,128], index: 1, kind: input, shape index: {}]   ;;  %s430_s2 = inlined_call_operand.vmem [shape: f32[1,128], index: 2, kind: input, shape index: {}]   ;;  %s431_s3 = inlined_call_operand.hbm [shape: f32[2,8,128], index: 3, kind: output, shape index: {}]  }
   0x1   :  { %9 = vsyncpa [#allocation6], 0 }
   0x2   :  { %10 = vsyncpa [#allocation4], 0  ;;  %s352_s12 = smov [#allocation2]   ;;  %s280_s16 = scalar_lea.hbm %s428_s0, 256 }
   0x3   :  { %s16_s13 = sshll.u32 %s352_s12, 4  ;;  %p281_p0 = scmp.ne.s32.totalorder %s428_s0, %s280_s16  ;;  %s17_s13 = int_to_ptr.vmem [resolvable:$true] %s16_s13 }
   0x4   :  { %p284_p1 = scmp.lt.u32.totalorder %s280_s16, %s428_s0 }
   0x6   :  { %p286_p2 = pnand %p284_p1, %p281_p0 }
   0x8   :  { %289 = shalt.err (!%p286_p2)
}
   0x9   :  { %s290_s21 = scalar_lea.vmem %s17_s13, 256  ;;  %p295_p4 = scmp.lt.s32.totalorder %s17_s13, %s17_s13 }
   0xa   :  { %p291_p3 = scmp.ne.s32.totalorder %s17_s13, %s290_s21  ;;  %p296_p5 = scmp.lt.s32.totalorder %s290_s21, %s290_s21 }
   0xc   :  { %p297_p6 = por %p296_p5, %p295_p4 }
   0xe   :  { %p298_p7 = pnand %p297_p6, %p291_p3 }
  0x10   :  { %301 = shalt.err (!%p298_p7)
}
  0x11   :  { %s353_s22 = smov 128   ;;  %s354_s23 = smov 8  }
  0x12   :  { %22 = dma.hbm_to_vmem [thread:$0]  %s428_s0, 256, %s17_s13, [#allocation3], %s353_s22, %s353_s22, %s354_s23  }
  0x13   :  { %s355_s26 = smov [#allocation5]   ;;  %s302_s30 = scalar_lea.hbm %s429_s1, 512 }
  0x14   :  { %s28_s27 = sshll.u32 %s355_s26, 4  ;;  %p303_p8 = scmp.ne.s32.totalorder %s429_s1, %s302_s30  ;;  %s29_s27 = int_to_ptr.vmem [resolvable:$true] %s28_s27 }
  0x15   :  { %p306_p9 = scmp.lt.u32.totalorder %s302_s30, %s429_s1 }
  0x17   :  { %p308_p10 = pnand %p306_p9, %p303_p8 }
  0x19   :  { %311 = shalt.err (!%p308_p10)
}
  0x1a   :  { %s312_s8 = scalar_lea.vmem %s29_s27, 512  ;;  %p317_p12 = scmp.lt.s32.totalorder %s29_s27, %s29_s27 }
  0x1b   :  { %p313_p11 = scmp.ne.s32.totalorder %s29_s27, %s312_s8  ;;  %p318_p13 = scmp.lt.s32.totalorder %s312_s8, %s312_s8 }
  0x1d   :  { %p319_p0 = por %p318_p13, %p317_p12 }
  0x1f   :  { %p320_p1 = pnand %p319_p0, %p313_p11 }
  0x21   :  { %323 = shalt.err (!%p320_p1)
}
  0x22   :  { %34 = dma.hbm_to_vmem [thread:$0]  %s429_s1, 512, %s29_s27, [#allocation6], %s353_s22, %s353_s22, %s354_s23  }
  0x23   :  { %346 = dma.done.wait [#allocation3], 256  }
  0x24   :  { %347 = vsyncadd [#allocation3], 4294967040 }
  0x25   :  { %348 = dma.done.wait [#allocation6], 512  }
  0x26   :  { %349 = vsyncadd [#allocation6], 4294966784  ;;  %v356_v0 = vmov 0.0|0.0   ;;  %vm357_vm0 = vmmov 0   ;;  %v358_v1 = vmov 0.0   ;;  %v43_v2 = vld [vmem:[#allocation5] sm:$0xff] }
  0x27   :  { %260 = vmatprep.subr.bf16.mxu0 %v356_v0  ;;  %266 = vmatprep.subr.bf16.mxu1 %v356_v0  ;;  %v44_v3 = vld [vmem:[#allocation5 + $0x8] sm:$0xff]  ;;  %v45_v4 = vld [vmem:[#allocation5 + $0x10] sm:$0xff]  ;;  %v46_v6 = vld [vmem:[#allocation5 + $0x18] sm:$0xff]  ;;  %vm55_vm1 = vcmask 261120   ;;  %s359_s11 = smov [#allocation7]  }
  0x28   :  { %246 = vmatprep.mubr.msk.f32.mxu0 %vm357_vm0, %v358_v1  ;;  %257 = vmatprep.mubr.msk.f32.mxu1 %vm357_vm0, %v358_v1  ;;  %v261_v5 = vpack.c.bf16 %v44_v3, %v43_v2  ;;  %v264_v7 = vpack.c.bf16 %v46_v6, %v45_v4  ;;  %v48_v8 = vld [vmem:[#allocation2] ss:$2 sm:$0xff]  ;;  %v131_v9 = vld [vmem:[#allocation2 + $0x1] ss:$2 sm:$0xff]  ;;  %s212_s12 = sshll.u32 %s359_s11, 4  ;;  %s213_s12 = int_to_ptr.vmem [resolvable:$true] %s212_s12 }
  0x29   :  { %v225_v10 = vld [vmem:[%s430_s2] ss:$0 sm:$0xff]  ;;  %s324_s13 = scalar_lea.vmem %s213_s12, 256  ;;  %p329_p3 = scmp.lt.s32.totalorder %s213_s12, %s213_s12 }
  0x2a   :  { %262 = vmatpush3.bf16.msra.mxu0 %v261_v5  ;;  %268 = vmatpush3.bf16.msra.mxu1 %v261_v5  ;;  %p325_p2 = scmp.ne.s32.totalorder %s213_s12, %s324_s13  ;;  %p330_p4 = scmp.lt.s32.totalorder %s324_s13, %s324_s13 }
  0x2b   :  { %263 = vmatprep.subr.bf16.mxu0 %v356_v0  ;;  %269 = vmatprep.subr.bf16.mxu1 %v356_v0 }
  0x2c   :  { %p331_p5 = por %p330_p4, %p329_p3 }
  0x2e   :  { %265 = vmatpush3.bf16.msra.mxu0 %v264_v7  ;;  %271 = vmatpush3.bf16.msra.mxu1 %v264_v7  ;;  %p332_p6 = pnand %p331_p5, %p325_p2 }
  0x31   :  { %247 = vmatmul.mubr.msk.f32.vlgmr.msra.gmra.mrb[0].mxu0 %vm55_vm1, %v48_v8  ;;  %258 = vmatmul.mubr.msk.f32.vlgmr.msra.gmra.mrb[0].mxu1 %vm55_vm1, %v131_v9 }
 0x104   :  { %v125_v11 = vpop.f32.mrb[0].mxu0  ;;  %v201_v12 = vpop.f32.mrb[0].mxu1 }
 0x105   :  { %v126_v13 = vadd.f32 %v225_v10, %v125_v11  ;;  %v202_v14 = vadd.f32 %v225_v10, %v201_v12  ;;  %v248_v15 = vpop.f32.mrb[1].mxu0  ;;  %v259_v16 = vpop.f32.mrb[1].mxu1 }
 0x107   :  { %129 = vst [vmem:[#allocation7] sm:$0xff] %v126_v13  ;;  %206 = vst [vmem:[#allocation7 + $0x8] sm:$0xff] %v202_v14 }
 0x108   :  { %335 = shalt.err (!%p332_p6)
}
 0x109   :  { %s336_s15 = scalar_lea.hbm %s431_s3, 256 }
 0x10a   :  { %p337_p7 = scmp.ne.s32.totalorder %s431_s3, %s336_s15  ;;  %p340_p8 = scmp.lt.u32.totalorder %s336_s15, %s431_s3 }
 0x10c   :  { %p342_p9 = pnand %p340_p8, %p337_p7 }
 0x10e   :  { %345 = shalt.err (!%p342_p9)
}
 0x10f   :  { %218 = dma.vmem_to_hbm [thread:$0]  %s213_s12, 256, %s431_s3, [#allocation4], %s353_s22, %s353_s22, %s354_s23  }
 0x110   :  { %350 = dma.done.wait [#allocation4], 256  }
 0x111   :  { %351 = vsyncadd [#allocation4], 4294967040 }
 0x112   :  { %222 = vsyncpa [#allocation3], 1 }
 0x113   :  { %223 = vsyncpa [#allocation6], 1 }
 0x114   :  { %224 = vsyncpa [#allocation4], 1 }

// kernel: tpu_custom_call.1
= control target key start
LH: loop header
LB: loop body
LE: loop exit
PB: predicated region body
PF: predicated region fallthrough
CT: control target
= control target key end

     0   :  { %8 = vsyncpa [#allocation3], 0  ;;  %s336_s0 = inlined_call_operand.hbm [shape: f32[16,32], index: 0, kind: input, shape index: {}]   ;;  %s337_s1 = inlined_call_operand.hbm [shape: f32[32,128], index: 1, kind: input, shape index: {}]   ;;  %s338_s2 = inlined_call_operand.vmem [shape: f32[1,128], index: 2, kind: input, shape index: {}]   ;;  %s339_s3 = inlined_call_operand.hbm [shape: f32[16,128], index: 3, kind: output, shape index: {}]  }
   0x1   :  { %9 = vsyncpa [#allocation6], 0 }
   0x2   :  { %10 = vsyncpa [#allocation4], 0  ;;  %s263_s12 = smov [#allocation2]   ;;  %s191_s16 = scalar_lea.hbm %s336_s0, 256 }
   0x3   :  { %s16_s13 = sshll.u32 %s263_s12, 4  ;;  %p192_p0 = scmp.ne.s32.totalorder %s336_s0, %s191_s16  ;;  %s17_s13 = int_to_ptr.vmem [resolvable:$true] %s16_s13 }
   0x4   :  { %p195_p1 = scmp.lt.u32.totalorder %s191_s16, %s336_s0 }
   0x6   :  { %p197_p2 = pnand %p195_p1, %p192_p0 }
   0x8   :  { %200 = shalt.err (!%p197_p2)
}
   0x9   :  { %s201_s21 = scalar_lea.vmem %s17_s13, 256  ;;  %p206_p4 = scmp.lt.s32.totalorder %s17_s13, %s17_s13 }
   0xa   :  { %p202_p3 = scmp.ne.s32.totalorder %s17_s13, %s201_s21  ;;  %p207_p5 = scmp.lt.s32.totalorder %s201_s21, %s201_s21 }
   0xc   :  { %p208_p6 = por %p207_p5, %p206_p4 }
   0xe   :  { %p209_p7 = pnand %p208_p6, %p202_p3 }
  0x10   :  { %212 = shalt.err (!%p209_p7)
}
  0x11   :  { %s264_s22 = smov 128   ;;  %s265_s23 = smov 8  }
  0x12   :  { %22 = dma.hbm_to_vmem [thread:$0]  %s336_s0, 256, %s17_s13, [#allocation3], %s264_s22, %s264_s22, %s265_s23  }
  0x13   :  { %s266_s26 = smov [#allocation5]   ;;  %s213_s30 = scalar_lea.hbm %s337_s1, 512 }
  0x14   :  { %s28_s27 = sshll.u32 %s266_s26, 4  ;;  %p214_p8 = scmp.ne.s32.totalorder %s337_s1, %s213_s30  ;;  %s29_s27 = int_to_ptr.vmem [resolvable:$true] %s28_s27 }
  0x15   :  { %p217_p9 = scmp.lt.u32.totalorder %s213_s30, %s337_s1 }
  0x17   :  { %p219_p10 = pnand %p217_p9, %p214_p8 }
  0x19   :  { %222 = shalt.err (!%p219_p10)
}
  0x1a   :  { %s223_s8 = scalar_lea.vmem %s29_s27, 512  ;;  %p228_p12 = scmp.lt.s32.totalorder %s29_s27, %s29_s27 }
  0x1b   :  { %p224_p11 = scmp.ne.s32.totalorder %s29_s27, %s223_s8  ;;  %p229_p13 = scmp.lt.s32.totalorder %s223_s8, %s223_s8 }
  0x1d   :  { %p230_p0 = por %p229_p13, %p228_p12 }
  0x1f   :  { %p231_p1 = pnand %p230_p0, %p224_p11 }
  0x21   :  { %234 = shalt.err (!%p231_p1)
}
  0x22   :  { %34 = dma.hbm_to_vmem [thread:$0]  %s337_s1, 512, %s29_s27, [#allocation6], %s264_s22, %s264_s22, %s265_s23  }
  0x23   :  { %257 = dma.done.wait [#allocation3], 256  }
  0x24   :  { %258 = vsyncadd [#allocation3], 4294967040 }
  0x25   :  { %259 = dma.done.wait [#allocation6], 512  }
  0x26   :  { %260 = vsyncadd [#allocation6], 4294966784  ;;  %vm56_vm0 = vcmask 261120   ;;  %v45_v0 = vld [vmem:[#allocation5] sm:$0xff]  ;;  %v46_v1 = vld [vmem:[#allocation5 + $0x8] sm:$0xff]  ;;  %s267_s11 = smov [#allocation7]  }
  0x27   :  { %v47_v2 = vld [vmem:[#allocation5 + $0x10] sm:$0xff]  ;;  %v178_v3 = vpack.c.bf16 %v46_v1, %v45_v0  ;;  %v48_v4 = vld [vmem:[#allocation5 + $0x18] sm:$0xff]  ;;  %s145_s12 = sshll.u32 %s267_s11, 4  ;;  %s146_s12 = int_to_ptr.vmem [resolvable:$true] %s145_s12 }
  0x28   :  { %v43_v5 = vld [vmem:[#allocation2] sm:$0xff]  ;;  %v182_v6 = vpack.c.bf16 %v48_v4, %v47_v2  ;;  %v44_v7 = vld [vmem:[#allocation2 + $0x8] sm:$0xff]  ;;  %s235_s13 = scalar_lea.vmem %s146_s12, 256  ;;  %p240_p3 = scmp.lt.s32.totalorder %s146_s12, %s146_s12 }
  0x29   :  { %175 = vmatprep.mubr.msk.f32.mxu0 %vm56_vm0, %v43_v5  ;;  %179 = vmatprep.subr.bf16.mxu0 %v178_v3  ;;  %v158_v8 = vld [vmem:[%s338_s2] ss:$0 sm:$0xff]  ;;  %p236_p2 = scmp.ne.s32.totalorder %s146_s12, %s235_s13  ;;  %p241_p4 = scmp.lt.s32.totalorder %s235_s13, %s235_s13 }
  0x2a   :  { %181 = vmatpush3.bf16.msra.mxu0 %v178_v3 }
  0x2b   :  { %183 = vmatprep.subr.bf16.mxu0 %v182_v6  ;;  %p242_p5 = por %p241_p4, %p240_p3 }
  0x2d   :  { %p243_p6 = pnand %p242_p5, %p236_p2 }
  0x2e   :  { %185 = vmatpush3.bf16.msra.mxu0 %v182_v6 }
  0x31   :  { %176 = vmatmul.mubr.msk.f32.vlgmr.msra.gmra.mrb[0].mxu0 %vm56_vm0, %v44_v7 }
 0x104   :  { %v177_v9 = vpop.f32.mrb[0].mxu0 }
 0x105   :  { %v135_v10 = vadd.f32 %v177_v9, %v158_v8  ;;  %v129_v11 = vpop.f32.mrb[1].mxu0 }
 0x106   :  { %v130_v12 = vadd.f32 %v158_v8, %v129_v11 }
 0x107   :  { %139 = vst [vmem:[#allocation7 + $0x8] sm:$0xff] %v135_v10 }
 0x108   :  { %138 = vst [vmem:[#allocation7] sm:$0xff] %v130_v12 }
 0x109   :  { %246 = shalt.err (!%p243_p6)
}
 0x10a   :  { %s247_s2 = scalar_lea.hbm %s339_s3, 256 }
 0x10b   :  { %p248_p7 = scmp.ne.s32.totalorder %s339_s3, %s247_s2  ;;  %p251_p8 = scmp.lt.u32.totalorder %s247_s2, %s339_s3 }
 0x10d   :  { %p253_p9 = pnand %p251_p8, %p248_p7 }
 0x10f   :  { %256 = shalt.err (!%p253_p9)
}
 0x110   :  { %151 = dma.vmem_to_hbm [thread:$0]  %s146_s12, 256, %s339_s3, [#allocation4], %s264_s22, %s264_s22, %s265_s23  }
 0x111   :  { %261 = dma.done.wait [#allocation4], 256  }
 0x112   :  { %262 = vsyncadd [#allocation4], 4294967040 }
 0x113   :  { %155 = vsyncpa [#allocation3], 1 }
 0x114   :  { %156 = vsyncpa [#allocation6], 1 }
 0x115   :  { %157 = vsyncpa [#allocation4], 1 }

</bundles_post_ra>
